<compile_context>
chip_gen: v7x
topology: tpu7x:2x2x1
jax: 0.10.0
libtpu: 0.0.40
codegen_flags: <defaults>
</compile_context>

<pallas_src>
import jax
import jax.numpy as jnp
from jax import lax
from jax.experimental import pallas as pl
from jax.experimental.pallas import tpu as pltpu

_LANE = 128


def _round_up(x, m):
    return ((x + m - 1) // m) * m


def autoencoder_forward_and_error(x, we, be, wd, bd, *,
                                  block_b=2048, use_bf16_matmul=False):
    """Fused forward + reconstruction error.

    Returns (reconstructed (B, D), encoded (B, H), recon_error (B,)).
    """
    B, D = x.shape
    H = we.shape[1]
    assert block_b % _LANE == 0, "block_b must be a multiple of 128"

    # Lane-align feature dims (zero padding is exact for this computation).
    dp = _round_up(D, _LANE)
    hp = _round_up(H, _LANE)

    mm_dtype = jnp.bfloat16 if use_bf16_matmul else jnp.float32
    w_bytes = 2 if use_bf16_matmul else 4

    # Batch tile: as large as requested, but no larger than the (padded) batch
    # and small enough to fit a conservative VMEM budget (v7x-safe).
    tb = min(block_b, _round_up(B, _LANE))

    def _footprint(t):
        # streamed, double-buffered: x in + recon out + z out + err out
        stream = 2 * (2 * t * dp + t * hp + t) * 4
        # resident, single-buffered: We + Wd (mm dtype) + biases (f32)
        resident = 2 * dp * hp * w_bytes + (dp + hp) * 4
        return stream + resident

    vmem_budget = 40 * 1024 * 1024
    while tb > _LANE and _footprint(tb) > vmem_budget:
        tb = max(_LANE, (tb // 2) // _LANE * _LANE)

    b_pad = tb * pl.cdiv(B, tb)

    # Pad inputs (batch rows and feature columns); padded rows/cols are exact
    # zeros through the whole pipeline and are sliced off below.
    x_p = jnp.pad(x.astype(jnp.float32), ((0, b_pad - B), (0, dp - D)))
    we_p = jnp.pad(we, ((0, dp - D), (0, hp - H))).astype(mm_dtype)
    wd_p = jnp.pad(wd, ((0, hp - H), (0, dp - D))).astype(mm_dtype)
    be_p = jnp.pad(be, (0, hp - H)).astype(jnp.float32).reshape(1, hp)
    bd_p = jnp.pad(bd, (0, dp - D)).astype(jnp.float32).reshape(1, dp)

    inv_d = 1.0 / float(D)   # mean over the ORIGINAL feature dim

    def _kernel(x_ref, we_ref, be_ref, wd_ref, bd_ref,
                recon_ref, z_ref, err_ref):
        xv = x_ref[...]                                        # (TB, Dp) f32

        # ---- encode: relu(x @ We + be) ----  (MXU in mm_dtype, acc f32)
        z = jnp.dot(xv.astype(mm_dtype), we_ref[...],
                    preferred_element_type=jnp.float32)        # (TB, Hp)
        z = jnp.maximum(z + be_ref[...], 0.0)                  # f32 VPU

        # ---- decode: z @ Wd + bd ----
        recon = jnp.dot(z.astype(mm_dtype), wd_ref[...],
                        preferred_element_type=jnp.float32)    # (TB, Dp)
        recon = recon + bd_ref[...]

        z_ref[...] = z.astype(z_ref.dtype)
        recon_ref[...] = recon.astype(recon_ref.dtype)

        # ---- get_reconstruction_error: mean((x - recon)^2, axis=1) ----
        # Lane-dense (1, TB): ones-row contraction over Dp on the MXU, then
        # an f32 scalar multiply by 1/D (no divide, no relayout, no 1/D folded
        # into a low-precision operand).
        diff = xv - recon
        d2 = diff * diff                                       # (TB, Dp) f32
        ones_row = jnp.ones((1, d2.shape[1]), dtype=jnp.float32)
        err = lax.dot_general(
            ones_row, d2,
            dimension_numbers=(((1,), (1,)), ((), ())),        # contract Dp
            preferred_element_type=jnp.float32)                # (1, TB)
        err_ref[...] = err * inv_d

    grid = (b_pad // tb,)

    vmem_limit = int(min(max(_footprint(tb) * 3 // 2, 16 * 1024 * 1024),
                         48 * 1024 * 1024))

    cost = pl.CostEstimate(
        flops=2 * b_pad * dp * hp * 2 + 2 * b_pad * dp,
        transcendentals=0,
        bytes_accessed=(b_pad * dp * 4                  # x in
                        + 2 * dp * hp * w_bytes         # weights
                        + (dp + hp) * 4                 # biases
                        + b_pad * dp * 4                # recon out
                        + b_pad * hp * 4                # z out
                        + b_pad * 4))                   # err out

    recon, z, err = pl.pallas_call(
        _kernel,
        out_shape=(
            jax.ShapeDtypeStruct((b_pad, dp), jnp.float32),    # reconstructed
            jax.ShapeDtypeStruct((b_pad, hp), jnp.float32),    # encoded
            jax.ShapeDtypeStruct((1, b_pad), jnp.float32),     # err (lane-dense)
        ),
        grid=grid,
        in_specs=[
            pl.BlockSpec((tb, dp), lambda i: (i, 0)),          # x: streamed
            pl.BlockSpec((dp, hp), lambda i: (0, 0),
                         pipeline_mode=pl.Buffered(1)),        # We: resident
            pl.BlockSpec((1, hp), lambda i: (0, 0),
                         pipeline_mode=pl.Buffered(1)),        # be: resident
            pl.BlockSpec((hp, dp), lambda i: (0, 0),
                         pipeline_mode=pl.Buffered(1)),        # Wd: resident
            pl.BlockSpec((1, dp), lambda i: (0, 0),
                         pipeline_mode=pl.Buffered(1)),        # bd: resident
        ],
        out_specs=(
            pl.BlockSpec((tb, dp), lambda i: (i, 0)),          # recon
            pl.BlockSpec((tb, hp), lambda i: (i, 0)),          # z
            pl.BlockSpec((1, tb), lambda i: (0, i)),           # err (batch on lanes)
        ),
        compiler_params=pltpu.CompilerParams(
            dimension_semantics=("parallel",),                 # megacore on v7x
            vmem_limit_bytes=vmem_limit,
        ),
        cost_estimate=cost,
    )(x_p, we_p, be_p, wd_p, bd_p)

    return recon[:B, :D], z[:B, :H], err[0, :B]


def _reference(x, we, be, wd, bd):
    z = jnp.maximum(x @ we + be, 0.0)
    recon = z @ wd + bd
    err = jnp.mean((x - recon) ** 2, axis=1)
    return recon, z, err


if __name__ == "__main__":
    # Small shapes consistent with a dense autoencoder forward. B is not a
    # multiple of 128 so the batch-padding path is exercised; D/H are not
    # multiples of 128 so the feature-padding path is exercised.
    B, D, H = 200, 32, 16

    key = jax.random.PRNGKey(0)
    kx, kwe, kbe, kwd, kbd = jax.random.split(key, 5)

    x = jax.random.normal(kx, (B, D), dtype=jnp.float32)
    we = jax.random.normal(kwe, (D, H), dtype=jnp.float32) * 0.1
    be = jax.random.normal(kbe, (H,), dtype=jnp.float32) * 0.1
    wd = jax.random.normal(kwd, (H, D), dtype=jnp.float32) * 0.1
    bd = jax.random.normal(kbd, (D,), dtype=jnp.float32) * 0.1

    r_ref, z_ref, e_ref = _reference(x, we, be, wd, bd)

    # --- f32 path (exact) ---
    recon, z, err = autoencoder_forward_and_error(x, we, be, wd, bd)
    jax.block_until_ready((recon, z, err))
    assert recon.shape == (B, D) and z.shape == (B, H) and err.shape == (B,)
    assert jnp.allclose(recon, r_ref, atol=1e-5, rtol=1e-5)
    assert jnp.allclose(z, z_ref, atol=1e-5, rtol=1e-5)
    assert jnp.allclose(err, e_ref, atol=1e-5, rtol=1e-5)

    # --- bf16 MXU path (production config; loose tolerance) ---
    recon_b, z_b, err_b = autoencoder_forward_and_error(
        x, we, be, wd, bd, use_bf16_matmul=True)
    jax.block_until_ready((recon_b, z_b, err_b))
    assert jnp.allclose(recon_b, r_ref, atol=5e-2, rtol=5e-2)
    assert jnp.allclose(err_b, e_ref, atol=5e-2, rtol=5e-2)

    print("KERNEL_OK")
</pallas_src>

<mosaic_0001>
module attributes {stable_mosaic.version = 11 : i64} {
  func.func @_kernel(%arg0: i32, %arg1: memref<256x128xf32, #tpu.memory_space<vmem>>, %arg2: memref<128x128xf32, #tpu.memory_space<vmem>>, %arg3: memref<1x128xf32, #tpu.memory_space<vmem>>, %arg4: memref<128x128xf32, #tpu.memory_space<vmem>>, %arg5: memref<1x128xf32, #tpu.memory_space<vmem>>, %arg6: memref<256x128xf32, #tpu.memory_space<vmem>>, %arg7: memref<256x128xf32, #tpu.memory_space<vmem>>, %arg8: memref<1x256xf32, #tpu.memory_space<vmem>>) attributes {dimension_semantics = [#tpu.dimension_semantics<parallel>], iteration_bounds = array<i64: 1>, scalar_prefetch = 0 : i64, scratch_operands = 0 : i64, tpu.core_type = #tpu.core_type<tc>, window_params = [{transform_indices = @transform_0, window_bounds = array<i64: 256, 128>}, {pipeline_mode = #tpu.pipeline_mode<synchronous>, transform_indices = @transform_1, window_bounds = array<i64: 128, 128>}, {pipeline_mode = #tpu.pipeline_mode<synchronous>, transform_indices = @transform_2, window_bounds = array<i64: 1, 128>}, {pipeline_mode = #tpu.pipeline_mode<synchronous>, transform_indices = @transform_3, window_bounds = array<i64: 128, 128>}, {pipeline_mode = #tpu.pipeline_mode<synchronous>, transform_indices = @transform_4, window_bounds = array<i64: 1, 128>}, {transform_indices = @transform_5, window_bounds = array<i64: 256, 128>}, {transform_indices = @transform_6, window_bounds = array<i64: 256, 128>}, {transform_indices = @transform_7, window_bounds = array<i64: 1, 256>}]} {
    %c0 = arith.constant 0 : index
    %c0_0 = arith.constant 0 : index
    %0 = vector.load %arg1[%c0, %c0_0] : memref<256x128xf32, #tpu.memory_space<vmem>>, vector<256x128xf32>
    %c0_1 = arith.constant 0 : index
    %c0_2 = arith.constant 0 : index
    %1 = vector.load %arg2[%c0_1, %c0_2] : memref<128x128xf32, #tpu.memory_space<vmem>>, vector<128x128xf32>
    %cst = arith.constant dense<0.000000e+00> : vector<256x128xf32>
    %2 = tpu.matmul %0, %1, %cst {dimension_numbers = #tpu.dot_dimension_numbers<[1], [0], [0], [1], [0, 0, 1, 1], [], []>} : vector<256x128xf32>, vector<128x128xf32>, vector<256x128xf32> -> vector<256x128xf32>
    %c0_3 = arith.constant 0 : index
    %c0_4 = arith.constant 0 : index
    %3 = vector.load %arg3[%c0_3, %c0_4] : memref<1x128xf32, #tpu.memory_space<vmem>>, vector<1x128xf32>
    %4 = vector.broadcast %3 : vector<1x128xf32> to vector<256x128xf32>
    %5 = arith.addf %2, %4 : vector<256x128xf32>
    %cst_5 = arith.constant 0.000000e+00 : f32
    %6 = vector.broadcast %cst_5 : f32 to vector<256x128xf32>
    %7 = arith.maximumf %5, %6 : vector<256x128xf32>
    %c0_6 = arith.constant 0 : index
    %c0_7 = arith.constant 0 : index
    %8 = vector.load %arg4[%c0_6, %c0_7] : memref<128x128xf32, #tpu.memory_space<vmem>>, vector<128x128xf32>
    %cst_8 = arith.constant dense<0.000000e+00> : vector<256x128xf32>
    %9 = tpu.matmul %7, %8, %cst_8 {dimension_numbers = #tpu.dot_dimension_numbers<[1], [0], [0], [1], [0, 0, 1, 1], [], []>} : vector<256x128xf32>, vector<128x128xf32>, vector<256x128xf32> -> vector<256x128xf32>
    %c0_9 = arith.constant 0 : index
    %c0_10 = arith.constant 0 : index
    %10 = vector.load %arg5[%c0_9, %c0_10] : memref<1x128xf32, #tpu.memory_space<vmem>>, vector<1x128xf32>
    %11 = vector.broadcast %10 : vector<1x128xf32> to vector<256x128xf32>
    %12 = arith.addf %9, %11 : vector<256x128xf32>
    %c0_11 = arith.constant 0 : index
    %c0_12 = arith.constant 0 : index
    %13 = vector.load %arg7[%c0_11, %c0_12] : memref<256x128xf32, #tpu.memory_space<vmem>>, vector<256x128xf32>
    tpu.vector_store %arg7[%c0_11, %c0_12], %7 {strides = array<i32>} : memref<256x128xf32, #tpu.memory_space<vmem>>, vector<256x128xf32>,
    %c0_13 = arith.constant 0 : index
    %c0_14 = arith.constant 0 : index
    %14 = vector.load %arg6[%c0_13, %c0_14] : memref<256x128xf32, #tpu.memory_space<vmem>>, vector<256x128xf32>
    tpu.vector_store %arg6[%c0_13, %c0_14], %12 {strides = array<i32>} : memref<256x128xf32, #tpu.memory_space<vmem>>, vector<256x128xf32>,
    %15 = arith.subf %0, %12 : vector<256x128xf32>
    %16 = arith.mulf %15, %15 : vector<256x128xf32>
    %cst_15 = arith.constant 1.000000e+00 : f32
    %17 = vector.broadcast %cst_15 : f32 to vector<1x128xf32>
    %cst_16 = arith.constant dense<0.000000e+00> : vector<1x256xf32>
    %18 = tpu.matmul %17, %16, %cst_16 {dimension_numbers = #tpu.dot_dimension_numbers<[1], [1], [0], [0], [0, 0, 1, 0], [], []>} : vector<1x128xf32>, vector<256x128xf32>, vector<1x256xf32> -> vector<1x256xf32>
    %cst_17 = arith.constant 3.125000e-02 : f32
    %19 = vector.broadcast %cst_17 : f32 to vector<1x256xf32>
    %20 = arith.mulf %18, %19 : vector<1x256xf32>
    %c0_18 = arith.constant 0 : index
    %c0_19 = arith.constant 0 : index
    %21 = vector.load %arg8[%c0_18, %c0_19] : memref<1x256xf32, #tpu.memory_space<vmem>>, vector<1x256xf32>
    tpu.vector_store %arg8[%c0_18, %c0_19], %20 {strides = array<i32>} : memref<1x256xf32, #tpu.memory_space<vmem>>, vector<1x256xf32>,
    return
  }
  func.func @transform_0(%arg0: i32) -> (i32, i32) {
    %c0_i32 = arith.constant 0 : i32
    %c0_i32_0 = arith.constant 0 : i32
    return %arg0, %c0_i32 : i32, i32
  }
  func.func @transform_1(%arg0: i32) -> (i32, i32) {
    %c0_i32 = arith.constant 0 : i32
    %c0_i32_0 = arith.constant 0 : i32
    %c0_i32_1 = arith.constant 0 : i32
    return %c0_i32, %c0_i32_0 : i32, i32
  }
  func.func @transform_2(%arg0: i32) -> (i32, i32) {
    %c0_i32 = arith.constant 0 : i32
    %c0_i32_0 = arith.constant 0 : i32
    %c0_i32_1 = arith.constant 0 : i32
    return %c0_i32, %c0_i32_0 : i32, i32
  }
  func.func @transform_3(%arg0: i32) -> (i32, i32) {
    %c0_i32 = arith.constant 0 : i32
    %c0_i32_0 = arith.constant 0 : i32
    %c0_i32_1 = arith.constant 0 : i32
    return %c0_i32, %c0_i32_0 : i32, i32
  }
  func.func @transform_4(%arg0: i32) -> (i32, i32) {
    %c0_i32 = arith.constant 0 : i32
    %c0_i32_0 = arith.constant 0 : i32
    %c0_i32_1 = arith.constant 0 : i32
    return %c0_i32, %c0_i32_0 : i32, i32
  }
  func.func @transform_5(%arg0: i32) -> (i32, i32) {
    %c0_i32 = arith.constant 0 : i32
    %c0_i32_0 = arith.constant 0 : i32
    return %arg0, %c0_i32 : i32, i32
  }
  func.func @transform_6(%arg0: i32) -> (i32, i32) {
    %c0_i32 = arith.constant 0 : i32
    %c0_i32_0 = arith.constant 0 : i32
    return %arg0, %c0_i32 : i32, i32
  }
  func.func @transform_7(%arg0: i32) -> (i32, i32) {
    %c0_i32 = arith.constant 0 : i32
    %c0_i32_0 = arith.constant 0 : i32
    return %c0_i32, %arg0 : i32, i32
  }
}

</mosaic_0001>

<bundles_post_ra>
// kernel: tpu_custom_call.1
= control target key start
LH: loop header
LB: loop body
LE: loop exit
PB: predicated region body
PF: predicated region fallthrough
CT: control target
= control target key end

     0   :  { %13 = vsyncpa [#allocation3], 0  ;;  %s1855_s0 = inlined_call_operand.hbm [shape: f32[256,128], index: 0, kind: input, shape index: {}]   ;;  %s1856_s1 = inlined_call_operand.hbm [shape: f32[128,128], index: 1, kind: input, shape index: {}]   ;;  %s1857_s2 = inlined_call_operand.vmem [shape: f32[1,128], index: 2, kind: input, shape index: {}]   ;;  %s1858_s3 = inlined_call_operand.hbm [shape: f32[128,128], index: 3, kind: input, shape index: {}]   ;;  %s1859_s4 = inlined_call_operand.vmem [shape: f32[1,128], index: 4, kind: input, shape index: {}]   ;;  %s1860_s5 = inlined_call_operand.hbm [shape: f32[256,128], index: 5, kind: output, shape index: {0}]   ;;  %s1861_s6 = inlined_call_operand.hbm [shape: f32[256,128], index: 6, kind: output, shape index: {1}]   ;;  %s1862_s7 = inlined_call_operand.hbm [shape: f32[1,256], index: 7, kind: output, shape index: {2}]  }
   0x1   :  { %14 = vsyncpa [#allocation6], 0 }
   0x2   :  { %15 = vsyncpa [#allocation4], 0 }
   0x3   :  { %16 = vsyncpa [#allocation10], 0  ;;  %s1435_s24 = smov [#allocation5]   ;;  %s1436_s26 = smov [#allocation2]  }
   0x4   :  { %s34_s25 = sshll.u32 %s1435_s24, 4  ;;  %s22_s27 = sshll.u32 %s1436_s26, 4  ;;  %s35_s25 = int_to_ptr.vmem [resolvable:$true] %s34_s25  ;;  %s1485_s27 = int_to_ptr.vmem [resolvable:$true] %s22_s27 }
   0x5   :  { %s1295_s30 = scalar_lea.hbm %s1856_s1, 2048 }
   0x6   :  { %p1296_p0 = scmp.ne.s32.totalorder %s1856_s1, %s1295_s30  ;;  %p1299_p1 = scmp.lt.u32.totalorder %s1295_s30, %s1856_s1 }
   0x8   :  { %p1301_p2 = pnand %p1299_p1, %p1296_p0 }
   0xa   :  { %1304 = shalt.err (!%p1301_p2)
}
   0xb   :  { %s1305_s12 = scalar_lea.vmem %s35_s25, 2048  ;;  %p1310_p4 = scmp.lt.s32.totalorder %s35_s25, %s35_s25 }
   0xc   :  { %p1306_p3 = scmp.ne.s32.totalorder %s35_s25, %s1305_s12  ;;  %p1311_p5 = scmp.lt.s32.totalorder %s1305_s12, %s1305_s12 }
   0xe   :  { %p1312_p6 = por %p1311_p5, %p1310_p4 }
  0x10   :  { %p1313_p7 = pnand %p1312_p6, %p1306_p3 }
  0x12   :  { %1316 = shalt.err (!%p1313_p7)
}
  0x13   :  { %s1437_s13 = smov 128   ;;  %s1438_s14 = smov 8  }
  0x14   :  { %40 = dma.hbm_to_vmem [thread:$0]  %s1856_s1, 2048, %s35_s25, [#allocation6], %s1437_s13, %s1437_s13, %s1438_s14  }
  0x15   :  { %s1317_s19 = scalar_lea.hbm %s1855_s0, 4096 }
  0x16   :  { %p1318_p8 = scmp.ne.s32.totalorder %s1855_s0, %s1317_s19  ;;  %p1321_p9 = scmp.lt.u32.totalorder %s1317_s19, %s1855_s0 }
  0x18   :  { %p1323_p10 = pnand %p1321_p9, %p1318_p8 }
  0x1a   :  { %1326 = shalt.err (!%p1323_p10)
}
  0x1b   :  { %s1327_s24 = scalar_lea.vmem %s1485_s27, 4096  ;;  %p1332_p12 = scmp.lt.s32.totalorder %s1485_s27, %s1485_s27 }
  0x1c   :  { %p1328_p11 = scmp.ne.s32.totalorder %s1485_s27, %s1327_s24  ;;  %p1333_p13 = scmp.lt.s32.totalorder %s1327_s24, %s1327_s24 }
  0x1e   :  { %p1334_p0 = por %p1333_p13, %p1332_p12 }
  0x20   :  { %p1335_p1 = pnand %p1334_p0, %p1328_p11 }
  0x22   :  { %1338 = shalt.err (!%p1335_p1)
}
  0x23   :  { %28 = dma.hbm_to_vmem [thread:$0]  %s1855_s0, 4096, %s1485_s27, [#allocation3], %s1437_s13, %s1437_s13, %s1438_s14  }
  0x24   :  { %s1439_s26 = smov [#allocation7]   ;;  %s1339_s8 = scalar_lea.hbm %s1858_s3, 2048 }
  0x25   :  { %s48_s28 = sshll.u32 %s1439_s26, 4  ;;  %p1340_p2 = scmp.ne.s32.totalorder %s1858_s3, %s1339_s8  ;;  %s49_s28 = int_to_ptr.vmem [resolvable:$true] %s48_s28 }
  0x26   :  { %p1343_p3 = scmp.lt.u32.totalorder %s1339_s8, %s1858_s3 }
  0x28   :  { %p1345_p4 = pnand %p1343_p3, %p1340_p2 }
  0x2a   :  { %1348 = shalt.err (!%p1345_p4)
}
  0x2b   :  { %s1349_s15 = scalar_lea.vmem %s49_s28, 2048  ;;  %p1354_p6 = scmp.lt.s32.totalorder %s49_s28, %s49_s28 }
  0x2c   :  { %p1350_p5 = scmp.ne.s32.totalorder %s49_s28, %s1349_s15  ;;  %p1355_p7 = scmp.lt.s32.totalorder %s1349_s15, %s1349_s15 }
  0x2e   :  { %p1356_p8 = por %p1355_p7, %p1354_p6 }
  0x30   :  { %p1357_p9 = pnand %p1356_p8, %p1350_p5 }
  0x32   :  { %1360 = shalt.err (!%p1357_p9)
}
  0x33   :  { %54 = dma.hbm_to_vmem [thread:$0]  %s1858_s3, 2048, %s49_s28, [#allocation6], %s1437_s13, %s1437_s13, %s1438_s14  }
  0x34   :  { %1427 = dma.done.wait [#allocation3], 4096  }
  0x35   :  { %1428 = vsyncadd [#allocation3], 4294963200 }
  0x36   :  { %1429 = dma.done.wait [#allocation6], 4096  }
  0x37   :  { %1430 = vsyncadd [#allocation6], 4294963200  ;;  %v98_v0 = vld [vmem:[#allocation5] sm:$0xff]  ;;  %v99_v1 = vld [vmem:[#allocation5 + $0x8] sm:$0xff]  ;;  %s1442_s19 = smov [#allocation8]  }
  0x38   :  { %v100_v2 = vld [vmem:[#allocation5 + $0x10] sm:$0xff]  ;;  %v1189_v3 = vpack.c.bf16 %v99_v1, %v98_v0  ;;  %v101_v4 = vld [vmem:[#allocation5 + $0x18] sm:$0xff]  ;;  %v102_v6 = vld [vmem:[#allocation5 + $0x20] sm:$0xff]  ;;  %s855_s20 = sshll.u32 %s1442_s19, 4  ;;  %s856_s20 = int_to_ptr.vmem [resolvable:$true] %s855_s20 }
  0x39   :  { %v1193_v5 = vpack.c.bf16 %v101_v4, %v100_v2  ;;  %v103_v7 = vld [vmem:[#allocation5 + $0x28] sm:$0xff]  ;;  %v1537_v9 = vld [vmem:[#allocation2] sm:$0xff]  ;;  %v104_v10 = vld [vmem:[#allocation5 + $0x30] sm:$0xff] }
  0x3a   :  { %1190 = vmatprep.subr.bf16.mxu0 %v1189_v3  ;;  %v1197_v8 = vpack.c.bf16 %v103_v7, %v102_v6  ;;  %v105_v11 = vld [vmem:[#allocation5 + $0x38] sm:$0xff]  ;;  %1061 = vmatprep.mubr.f32.mxu0 %v1537_v9  ;;  %v106_v13 = vld [vmem:[#allocation5 + $0x40] sm:$0xff]  ;;  %v107_v14 = vld [vmem:[#allocation5 + $0x48] sm:$0xff] }
  0x3b   :  { %1192 = vmatpush3.bf16.msra.mxu0 %v1189_v3  ;;  %v1201_v12 = vpack.c.bf16 %v105_v11, %v104_v10  ;;  %v1205_v15 = vpack.c.bf16 %v107_v14, %v106_v13  ;;  %v108_v16 = vld [vmem:[#allocation5 + $0x50] sm:$0xff]  ;;  %v109_v17 = vld [vmem:[#allocation5 + $0x58] sm:$0xff]  ;;  %v378_v18 = vld [vmem:[#allocation7] sm:$0xff] }
  0x3c   :  { %1194 = vmatprep.subr.bf16.mxu0 %v1193_v5  ;;  %v379_v19 = vld [vmem:[#allocation7 + $0x8] sm:$0xff]  ;;  %v380_v20 = vld [vmem:[#allocation7 + $0x10] sm:$0xff]  ;;  %v1209_v21 = vpack.c.bf16 %v109_v17, %v108_v16  ;;  %v110_v22 = vld [vmem:[#allocation5 + $0x60] sm:$0xff] }
  0x3d   :  { %v1221_v23 = vpack.c.bf16 %v379_v19, %v378_v18  ;;  %v381_v24 = vld [vmem:[#allocation7 + $0x18] sm:$0xff]  ;;  %v111_v25 = vld [vmem:[#allocation5 + $0x68] sm:$0xff]  ;;  %v382_v27 = vld [vmem:[#allocation7 + $0x20] sm:$0xff] }
  0x3e   :  { %v1225_v26 = vpack.c.bf16 %v381_v24, %v380_v20  ;;  %v383_v28 = vld [vmem:[#allocation7 + $0x28] sm:$0xff]  ;;  %v1213_v29 = vpack.c.bf16 %v111_v25, %v110_v22  ;;  %v112_v30 = vld [vmem:[#allocation5 + $0x70] sm:$0xff]  ;;  %v113_v32 = vld [vmem:[#allocation5 + $0x78] sm:$0xff] }
  0x3f   :  { %1196 = vmatpush3.bf16.msra.mxu0 %v1193_v5  ;;  %1222 = vmatprep.subr.bf16.mxu1 %v1221_v23  ;;  %v1229_v31 = vpack.c.bf16 %v383_v28, %v382_v27  ;;  %v384_v33 = vld [vmem:[#allocation7 + $0x30] sm:$0xff]  ;;  %v385_v34 = vld [vmem:[#allocation7 + $0x38] sm:$0xff]  ;;  %v1217_v35 = vpack.c.bf16 %v113_v32, %v112_v30  ;;  %v386_v37 = vld [vmem:[#allocation7 + $0x40] sm:$0xff] }
  0x40   :  { %1198 = vmatprep.subr.bf16.mxu0 %v1197_v8  ;;  %1224 = vmatpush3.bf16.msra.mxu1 %v1221_v23  ;;  %v1233_v36 = vpack.c.bf16 %v385_v34, %v384_v33  ;;  %v387_v38 = vld [vmem:[#allocation7 + $0x48] sm:$0xff]  ;;  %v388_v40 = vld [vmem:[#allocation7 + $0x50] sm:$0xff]  ;;  %v389_v41 = vld [vmem:[#allocation7 + $0x58] sm:$0xff] }
  0x41   :  { %1226 = vmatprep.subr.bf16.mxu1 %v1225_v26  ;;  %v1237_v39 = vpack.c.bf16 %v387_v38, %v386_v37  ;;  %v1540_v42 = vld [vmem:[#allocation2 + $0x8] sm:$0xff]  ;;  %v1542_v43 = vld [vmem:[#allocation2 + $0x10] sm:$0xff]  ;;  %v1241_v44 = vpack.c.bf16 %v389_v41, %v388_v40  ;;  %v390_v45 = vld [vmem:[#allocation7 + $0x60] sm:$0xff] }
  0x42   :  { %v391_v46 = vld [vmem:[#allocation7 + $0x68] sm:$0xff]  ;;  %v1546_v47 = vld [vmem:[#allocation2 + $0x18] sm:$0xff]  ;;  %v1548_v48 = vld [vmem:[#allocation2 + $0x20] sm:$0xff] }
  0x43   :  { %1200 = vmatpush3.bf16.msra.mxu0 %v1197_v8  ;;  %v1245_v49 = vpack.c.bf16 %v391_v46, %v390_v45  ;;  %v1552_v50 = vld [vmem:[#allocation2 + $0x28] sm:$0xff]  ;;  %v1554_v51 = vld [vmem:[#allocation2 + $0x30] sm:$0xff]  ;;  %v1558_v52 = vld [vmem:[#allocation2 + $0x38] sm:$0xff] }
  0x44   :  { %1202 = vmatprep.subr.bf16.mxu0 %v1201_v12  ;;  %1228 = vmatpush3.bf16.msra.mxu1 %v1225_v26  ;;  %v1560_v53 = vld [vmem:[#allocation2 + $0x40] sm:$0xff]  ;;  %v1564_v54 = vld [vmem:[#allocation2 + $0x48] sm:$0xff]  ;;  %v1566_v55 = vld [vmem:[#allocation2 + $0x50] sm:$0xff] }
  0x45   :  { %1230 = vmatprep.subr.bf16.mxu1 %v1229_v31  ;;  %v1570_v56 = vld [vmem:[#allocation2 + $0x58] sm:$0xff]  ;;  %v1572_v57 = vld [vmem:[#allocation2 + $0x60] sm:$0xff]  ;;  %v1576_v58 = vld [vmem:[#allocation2 + $0x68] sm:$0xff] }
  0x46   :  { %v1578_v59 = vld [vmem:[#allocation2 + $0x70] sm:$0xff]  ;;  %v1582_v60 = vld [vmem:[#allocation2 + $0x78] sm:$0xff]  ;;  %v1584_v61 = vld [vmem:[#allocation2 + $0x80] sm:$0xff] }
  0x47   :  { %1204 = vmatpush3.bf16.msra.mxu0 %v1201_v12  ;;  %v1588_v62 = vld [vmem:[#allocation2 + $0x88] sm:$0xff]  ;;  %v1590_v63 = vld [vmem:[#allocation2 + $0x90] sm:$0xff]  ;;  %v1594_v0 = vld [vmem:[#allocation2 + $0x98] sm:$0xff] }
  0x48   :  { %1206 = vmatprep.subr.bf16.mxu0 %v1205_v15  ;;  %1232 = vmatpush3.bf16.msra.mxu1 %v1229_v31  ;;  %v1596_v1 = vld [vmem:[#allocation2 + $0xa0] sm:$0xff]  ;;  %v1600_v2 = vld [vmem:[#allocation2 + $0xa8] sm:$0xff]  ;;  %v1602_v3 = vld [vmem:[#allocation2 + $0xb0] sm:$0xff] }
  0x49   :  { %1234 = vmatprep.subr.bf16.mxu1 %v1233_v36  ;;  %v1606_v4 = vld [vmem:[#allocation2 + $0xb8] sm:$0xff]  ;;  %v1608_v5 = vld [vmem:[#allocation2 + $0xc0] sm:$0xff]  ;;  %v1612_v6 = vld [vmem:[#allocation2 + $0xc8] sm:$0xff] }
  0x4a   :  { %v1614_v7 = vld [vmem:[#allocation2 + $0xd0] sm:$0xff]  ;;  %v1618_v8 = vld [vmem:[#allocation2 + $0xd8] sm:$0xff]  ;;  %v1620_v10 = vld [vmem:[#allocation2 + $0xe0] sm:$0xff] }
  0x4b   :  { %1208 = vmatpush3.bf16.msra.mxu0 %v1205_v15  ;;  %v1624_v11 = vld [vmem:[#allocation2 + $0xe8] sm:$0xff]  ;;  %v1626_v12 = vld [vmem:[#allocation2 + $0xf0] sm:$0xff]  ;;  %v1630_v13 = vld [vmem:[#allocation2 + $0xf8] sm:$0xff] }
  0x4c   :  { %1210 = vmatprep.subr.bf16.mxu0 %v1209_v21  ;;  %1236 = vmatpush3.bf16.msra.mxu1 %v1233_v36  ;;  %v392_v14 = vld [vmem:[#allocation7 + $0x70] sm:$0xff]  ;;  %v393_v15 = vld [vmem:[#allocation7 + $0x78] sm:$0xff]  ;;  %v1636_v17 = vld [vmem:[%s1857_s2] ss:$0 sm:$0xff] }
  0x4d   :  { %1238 = vmatprep.subr.bf16.mxu1 %v1237_v39  ;;  %v1249_v16 = vpack.c.bf16 %v393_v15, %v392_v14 }
  0x4f   :  { %1212 = vmatpush3.bf16.msra.mxu0 %v1209_v21 }
  0x50   :  { %1214 = vmatprep.subr.bf16.mxu0 %v1213_v29  ;;  %1240 = vmatpush3.bf16.msra.mxu1 %v1237_v39 }
  0x51   :  { %1242 = vmatprep.subr.bf16.mxu1 %v1241_v44 }
  0x53   :  { %1216 = vmatpush3.bf16.msra.mxu0 %v1213_v29 }
  0x54   :  { %1218 = vmatprep.subr.bf16.mxu0 %v1217_v35  ;;  %1244 = vmatpush3.bf16.msra.mxu1 %v1241_v44 }
  0x55   :  { %1246 = vmatprep.subr.bf16.mxu1 %v1245_v49 }
  0x57   :  { %1220 = vmatpush3.bf16.msra.mxu0 %v1217_v35 }
  0x58   :  { %1248 = vmatpush3.bf16.msra.mxu1 %v1245_v49 }
  0x59   :  { %1250 = vmatprep.subr.bf16.mxu1 %v1249_v16 }
  0x5a   :  { %1062 = vmatmul.mubr.f32.vlgmr.msra.gmra.mrb[0].mxu0 %v1540_v42 }
  0x5b   :  { %1064 = vmatprep.mubr.f32.mxu0 %v1542_v43 }
  0x5c   :  { %1252 = vmatpush3.bf16.msra.mxu1 %v1249_v16 }
  0x5e   :  { %1065 = vmatmul.mubr.f32.gmra.mrb[2].mxu0 %v1546_v47 }
  0x5f   :  { %1067 = vmatprep.mubr.f32.mxu0 %v1548_v48 }
  0x62   :  { %1068 = vmatmul.mubr.f32.gmra.mrb[4].mxu0 %v1552_v50 }
  0x63   :  { %1070 = vmatprep.mubr.f32.mxu0 %v1554_v51 }
  0x66   :  { %1071 = vmatmul.mubr.f32.gmra.mrb[6].mxu0 %v1558_v52 }
  0x67   :  { %1073 = vmatprep.mubr.f32.mxu0 %v1560_v53 }
  0x6a   :  { %1074 = vmatmul.mubr.f32.gmra.mrb[8].mxu0 %v1564_v54 }
  0x6b   :  { %1076 = vmatprep.mubr.f32.mxu0 %v1566_v55 }
  0x6e   :  { %1077 = vmatmul.mubr.f32.gmra.mrb[10].mxu0 %v1570_v56 }
  0x6f   :  { %1079 = vmatprep.mubr.f32.mxu0 %v1572_v57 }
  0x72   :  { %1080 = vmatmul.mubr.f32.gmra.mrb[12].mxu0 %v1576_v58 }
  0x73   :  { %1082 = vmatprep.mubr.f32.mxu0 %v1578_v59 }
  0x76   :  { %1083 = vmatmul.mubr.f32.gmra.mrb[14].mxu0 %v1582_v60 }
  0x77   :  { %1085 = vmatprep.mubr.f32.mxu0 %v1584_v61 }
  0x7a   :  { %1086 = vmatmul.mubr.f32.gmra.mrb[16].mxu0 %v1588_v62 }
  0x7b   :  { %1088 = vmatprep.mubr.f32.mxu0 %v1590_v63 }
  0x7e   :  { %1089 = vmatmul.mubr.f32.gmra.mrb[18].mxu0 %v1594_v0 }
  0x7f   :  { %1091 = vmatprep.mubr.f32.mxu0 %v1596_v1 }
  0x82   :  { %1092 = vmatmul.mubr.f32.gmra.mrb[20].mxu0 %v1600_v2 }
  0x83   :  { %1094 = vmatprep.mubr.f32.mxu0 %v1602_v3 }
  0x86   :  { %1095 = vmatmul.mubr.f32.gmra.mrb[22].mxu0 %v1606_v4 }
  0x87   :  { %1097 = vmatprep.mubr.f32.mxu0 %v1608_v5 }
  0x8a   :  { %1098 = vmatmul.mubr.f32.gmra.mrb[24].mxu0 %v1612_v6 }
  0x8b   :  { %1100 = vmatprep.mubr.f32.mxu0 %v1614_v7 }
  0x8e   :  { %1101 = vmatmul.mubr.f32.gmra.mrb[26].mxu0 %v1618_v8 }
  0x8f   :  { %1103 = vmatprep.mubr.f32.mxu0 %v1620_v10 }
  0x92   :  { %1104 = vmatmul.mubr.f32.gmra.mrb[28].mxu0 %v1624_v11 }
  0x93   :  { %1106 = vmatprep.mubr.f32.mxu0 %v1626_v12 }
  0x96   :  { %1107 = vmatmul.mubr.f32.gmra.mrb[30].mxu0 %v1630_v13 }
 0x12d   :  { %v1063_v18 = vpop.f32.mrb[0].mxu0 }
 0x12e   :  { %v193_v19 = vadd.f32 %v1063_v18, %v1636_v17  ;;  %v187_v20 = vpop.f32.mrb[1].mxu0 }
 0x12f   :  { %v188_v21 = vadd.f32 %v1636_v17, %v187_v20 }
 0x130   :  { %v347_v22 = vmax.f32 %v193_v19, 0.0 }
 0x131   :  { %v346_v23 = vmax.f32 %v188_v21, 0.0  ;;  %v1066_v24 = vpop.f32.mrb[2].mxu0 }
 0x132   :  { %627 = vst [vmem:[#allocation9 + $0x8] sm:$0xff] %v347_v22  ;;  %v203_v25 = vadd.f32 %v1066_v24, %v1636_v17  ;;  %v197_v26 = vpop.f32.mrb[3].mxu0 }
 0x133   :  { %626 = vst [vmem:[#allocation9] sm:$0xff] %v346_v23  ;;  %v198_v27 = vadd.f32 %v1636_v17, %v197_v26  ;;  %1141 = vmatprep.mubr.f32.mxu1 %v346_v23 }
 0x134   :  { %v349_v28 = vmax.f32 %v203_v25, 0.0  ;;  %1142 = vmatmul.mubr.f32.vlgmr.msra.gmra.mrb[0].mxu1 %v347_v22 }
 0x135   :  { %v348_v29 = vmax.f32 %v198_v27, 0.0  ;;  %v1069_v30 = vpop.f32.mrb[4].mxu0 }
 0x136   :  { %629 = vst [vmem:[#allocation9 + $0x18] sm:$0xff] %v349_v28  ;;  %v213_v31 = vadd.f32 %v1069_v30, %v1636_v17  ;;  %v207_v32 = vpop.f32.mrb[5].mxu0 }
 0x137   :  { %628 = vst [vmem:[#allocation9 + $0x10] sm:$0xff] %v348_v29  ;;  %v208_v33 = vadd.f32 %v1636_v17, %v207_v32  ;;  %1144 = vmatprep.mubr.f32.mxu1 %v348_v29 }
 0x138   :  { %v351_v34 = vmax.f32 %v213_v31, 0.0  ;;  %1145 = vmatmul.mubr.f32.gmra.mrb[2].mxu1 %v349_v28 }
 0x139   :  { %v350_v35 = vmax.f32 %v208_v33, 0.0  ;;  %v1072_v36 = vpop.f32.mrb[6].mxu0 }
 0x13a   :  { %631 = vst [vmem:[#allocation9 + $0x28] sm:$0xff] %v351_v34  ;;  %v223_v37 = vadd.f32 %v1072_v36, %v1636_v17  ;;  %v217_v38 = vpop.f32.mrb[7].mxu0 }
 0x13b   :  { %630 = vst [vmem:[#allocation9 + $0x20] sm:$0xff] %v350_v35  ;;  %v218_v39 = vadd.f32 %v1636_v17, %v217_v38  ;;  %1147 = vmatprep.mubr.f32.mxu1 %v350_v35 }
 0x13c   :  { %v353_v40 = vmax.f32 %v223_v37, 0.0  ;;  %1148 = vmatmul.mubr.f32.gmra.mrb[4].mxu1 %v351_v34 }
 0x13d   :  { %v352_v41 = vmax.f32 %v218_v39, 0.0  ;;  %v1075_v44 = vpop.f32.mrb[8].mxu0 }
 0x13e   :  { %633 = vst [vmem:[#allocation9 + $0x38] sm:$0xff] %v353_v40  ;;  %v233_v45 = vadd.f32 %v1075_v44, %v1636_v17  ;;  %v227_v46 = vpop.f32.mrb[9].mxu0 }
 0x13f   :  { %632 = vst [vmem:[#allocation9 + $0x30] sm:$0xff] %v352_v41  ;;  %v228_v49 = vadd.f32 %v1636_v17, %v227_v46  ;;  %1150 = vmatprep.mubr.f32.mxu1 %v352_v41 }
 0x140   :  { %v355_v14 = vmax.f32 %v233_v45, 0.0  ;;  %1151 = vmatmul.mubr.f32.gmra.mrb[6].mxu1 %v353_v40 }
 0x141   :  { %v354_v15 = vmax.f32 %v228_v49, 0.0  ;;  %v1078_v16 = vpop.f32.mrb[10].mxu0 }
 0x142   :  { %635 = vst [vmem:[#allocation9 + $0x48] sm:$0xff] %v355_v14  ;;  %v243_v18 = vadd.f32 %v1078_v16, %v1636_v17  ;;  %v237_v19 = vpop.f32.mrb[11].mxu0 }
 0x143   :  { %634 = vst [vmem:[#allocation9 + $0x40] sm:$0xff] %v354_v15  ;;  %v238_v20 = vadd.f32 %v1636_v17, %v237_v19  ;;  %1153 = vmatprep.mubr.f32.mxu1 %v354_v15 }
 0x144   :  { %v357_v21 = vmax.f32 %v243_v18, 0.0  ;;  %1154 = vmatmul.mubr.f32.gmra.mrb[8].mxu1 %v355_v14 }
 0x145   :  { %v356_v22 = vmax.f32 %v238_v20, 0.0  ;;  %v1081_v23 = vpop.f32.mrb[12].mxu0 }
 0x146   :  { %637 = vst [vmem:[#allocation9 + $0x58] sm:$0xff] %v357_v21  ;;  %v253_v24 = vadd.f32 %v1081_v23, %v1636_v17  ;;  %v247_v25 = vpop.f32.mrb[13].mxu0 }
 0x147   :  { %636 = vst [vmem:[#allocation9 + $0x50] sm:$0xff] %v356_v22  ;;  %v248_v26 = vadd.f32 %v1636_v17, %v247_v25  ;;  %1156 = vmatprep.mubr.f32.mxu1 %v356_v22 }
 0x148   :  { %v359_v27 = vmax.f32 %v253_v24, 0.0  ;;  %1157 = vmatmul.mubr.f32.gmra.mrb[10].mxu1 %v357_v21 }
 0x149   :  { %v358_v28 = vmax.f32 %v248_v26, 0.0  ;;  %v1084_v29 = vpop.f32.mrb[14].mxu0 }
 0x14a   :  { %639 = vst [vmem:[#allocation9 + $0x68] sm:$0xff] %v359_v27  ;;  %v263_v30 = vadd.f32 %v1084_v29, %v1636_v17  ;;  %v257_v31 = vpop.f32.mrb[15].mxu0 }
 0x14b   :  { %638 = vst [vmem:[#allocation9 + $0x60] sm:$0xff] %v358_v28  ;;  %v258_v32 = vadd.f32 %v1636_v17, %v257_v31  ;;  %1159 = vmatprep.mubr.f32.mxu1 %v358_v28 }
 0x14c   :  { %v361_v33 = vmax.f32 %v263_v30, 0.0  ;;  %1160 = vmatmul.mubr.f32.gmra.mrb[12].mxu1 %v359_v27 }
 0x14d   :  { %v360_v34 = vmax.f32 %v258_v32, 0.0  ;;  %v1087_v35 = vpop.f32.mrb[16].mxu0 }
 0x14e   :  { %641 = vst [vmem:[#allocation9 + $0x78] sm:$0xff] %v361_v33  ;;  %v273_v36 = vadd.f32 %v1087_v35, %v1636_v17  ;;  %v267_v37 = vpop.f32.mrb[17].mxu0 }
 0x14f   :  { %640 = vst [vmem:[#allocation9 + $0x70] sm:$0xff] %v360_v34  ;;  %v268_v38 = vadd.f32 %v1636_v17, %v267_v37  ;;  %1162 = vmatprep.mubr.f32.mxu1 %v360_v34 }
 0x150   :  { %v363_v39 = vmax.f32 %v273_v36, 0.0  ;;  %1163 = vmatmul.mubr.f32.gmra.mrb[14].mxu1 %v361_v33 }
 0x151   :  { %v362_v40 = vmax.f32 %v268_v38, 0.0  ;;  %v1090_v41 = vpop.f32.mrb[18].mxu0 }
 0x152   :  { %643 = vst [vmem:[#allocation9 + $0x88] sm:$0xff] %v363_v39  ;;  %v283_v44 = vadd.f32 %v1090_v41, %v1636_v17  ;;  %v277_v45 = vpop.f32.mrb[19].mxu0 }
 0x153   :  { %642 = vst [vmem:[#allocation9 + $0x80] sm:$0xff] %v362_v40  ;;  %v278_v46 = vadd.f32 %v1636_v17, %v277_v45  ;;  %1165 = vmatprep.mubr.f32.mxu1 %v362_v40 }
 0x154   :  { %v365_v49 = vmax.f32 %v283_v44, 0.0  ;;  %1166 = vmatmul.mubr.f32.gmra.mrb[16].mxu1 %v363_v39 }
 0x155   :  { %v364_v14 = vmax.f32 %v278_v46, 0.0  ;;  %v1093_v15 = vpop.f32.mrb[20].mxu0 }
 0x156   :  { %645 = vst [vmem:[#allocation9 + $0x98] sm:$0xff] %v365_v49  ;;  %v293_v16 = vadd.f32 %v1093_v15, %v1636_v17  ;;  %v287_v18 = vpop.f32.mrb[21].mxu0 }
 0x157   :  { %644 = vst [vmem:[#allocation9 + $0x90] sm:$0xff] %v364_v14  ;;  %1168 = vmatprep.mubr.f32.mxu1 %v364_v14  ;;  %v288_v19 = vadd.f32 %v1636_v17, %v287_v18 }
 0x158   :  { %1169 = vmatmul.mubr.f32.gmra.mrb[18].mxu1 %v365_v49  ;;  %v367_v20 = vmax.f32 %v293_v16, 0.0 }
 0x159   :  { %v366_v21 = vmax.f32 %v288_v19, 0.0  ;;  %v1096_v22 = vpop.f32.mrb[22].mxu0 }
 0x15a   :  { %647 = vst [vmem:[#allocation9 + $0xa8] sm:$0xff] %v367_v20  ;;  %v303_v23 = vadd.f32 %v1096_v22, %v1636_v17  ;;  %v297_v24 = vpop.f32.mrb[23].mxu0  ;;  %v1674_v22 = vld [vmem:[%s1859_s4] ss:$0 sm:$0xff]  ;;  %s1441_s4 = smov [#allocation9]  }
 0x15b   :  { %646 = vst [vmem:[#allocation9 + $0xa0] sm:$0xff] %v366_v21  ;;  %1171 = vmatprep.mubr.f32.mxu1 %v366_v21  ;;  %v298_v25 = vadd.f32 %v1636_v17, %v297_v24  ;;  %v1440_v21 = vmov 1.0   ;;  %s867_s18 = sshll.u32 %s1441_s4, 4  ;;  %s868_s18 = int_to_ptr.vmem [resolvable:$true] %s867_s18 }
 0x15c   :  { %1172 = vmatmul.mubr.f32.gmra.mrb[20].mxu1 %v367_v20  ;;  %v369_v26 = vmax.f32 %v303_v23, 0.0  ;;  %1027 = vmatprep.mubr.f32.mxu0 %v1440_v21  ;;  %s1361_s21 = scalar_lea.vmem %s868_s18, 4096  ;;  %p1366_p11 = scmp.lt.s32.totalorder %s868_s18, %s868_s18 }
 0x15d   :  { %v368_v27 = vmax.f32 %v298_v25, 0.0  ;;  %v1099_v28 = vpop.f32.mrb[24].mxu0  ;;  %p1362_p10 = scmp.ne.s32.totalorder %s868_s18, %s1361_s21  ;;  %p1367_p12 = scmp.lt.s32.totalorder %s1361_s21, %s1361_s21 }
 0x15e   :  { %649 = vst [vmem:[#allocation9 + $0xb8] sm:$0xff] %v369_v26  ;;  %v313_v29 = vadd.f32 %v1099_v28, %v1636_v17  ;;  %v307_v30 = vpop.f32.mrb[25].mxu0 }
 0x15f   :  { %648 = vst [vmem:[#allocation9 + $0xb0] sm:$0xff] %v368_v27  ;;  %1174 = vmatprep.mubr.f32.mxu1 %v368_v27  ;;  %v308_v31 = vadd.f32 %v1636_v17, %v307_v30  ;;  %p1368_p13 = por %p1367_p12, %p1366_p11 }
 0x160   :  { %1175 = vmatmul.mubr.f32.gmra.mrb[22].mxu1 %v369_v26  ;;  %v371_v32 = vmax.f32 %v313_v29, 0.0 }
 0x161   :  { %v370_v33 = vmax.f32 %v308_v31, 0.0  ;;  %v1102_v34 = vpop.f32.mrb[26].mxu0  ;;  %p1369_p0 = pnand %p1368_p13, %p1362_p10 }
 0x162   :  { %651 = vst [vmem:[#allocation9 + $0xc8] sm:$0xff] %v371_v32  ;;  %v323_v35 = vadd.f32 %v1102_v34, %v1636_v17  ;;  %v317_v36 = vpop.f32.mrb[27].mxu0 }
 0x163   :  { %650 = vst [vmem:[#allocation9 + $0xc0] sm:$0xff] %v370_v33  ;;  %1177 = vmatprep.mubr.f32.mxu1 %v370_v33  ;;  %v318_v37 = vadd.f32 %v1636_v17, %v317_v36 }
 0x164   :  { %1178 = vmatmul.mubr.f32.gmra.mrb[24].mxu1 %v371_v32  ;;  %v373_v38 = vmax.f32 %v323_v35, 0.0 }
 0x165   :  { %v372_v39 = vmax.f32 %v318_v37, 0.0  ;;  %v1105_v40 = vpop.f32.mrb[28].mxu0 }
 0x166   :  { %653 = vst [vmem:[#allocation9 + $0xd8] sm:$0xff] %v373_v38  ;;  %v333_v41 = vadd.f32 %v1105_v40, %v1636_v17  ;;  %v327_v44 = vpop.f32.mrb[29].mxu0 }
 0x167   :  { %652 = vst [vmem:[#allocation9 + $0xd0] sm:$0xff] %v372_v39  ;;  %1180 = vmatprep.mubr.f32.mxu1 %v372_v39  ;;  %v328_v45 = vadd.f32 %v1636_v17, %v327_v44 }
 0x168   :  { %1181 = vmatmul.mubr.f32.gmra.mrb[26].mxu1 %v373_v38  ;;  %v375_v46 = vmax.f32 %v333_v41, 0.0 }
 0x169   :  { %v374_v49 = vmax.f32 %v328_v45, 0.0  ;;  %v1108_v14 = vpop.f32.mrb[30].mxu0 }
 0x16a   :  { %655 = vst [vmem:[#allocation9 + $0xe8] sm:$0xff] %v375_v46  ;;  %v343_v15 = vadd.f32 %v1108_v14, %v1636_v17  ;;  %v337_v16 = vpop.f32.mrb[31].mxu0 }
 0x16b   :  { %654 = vst [vmem:[#allocation9 + $0xe0] sm:$0xff] %v374_v49  ;;  %1183 = vmatprep.mubr.f32.mxu1 %v374_v49  ;;  %v338_v18 = vadd.f32 %v1636_v17, %v337_v16 }
 0x16c   :  { %1184 = vmatmul.mubr.f32.gmra.mrb[28].mxu1 %v375_v46  ;;  %v377_v19 = vmax.f32 %v343_v15, 0.0 }
 0x16d   :  { %v376_v20 = vmax.f32 %v338_v18, 0.0 }
 0x16e   :  { %657 = vst [vmem:[#allocation9 + $0xf8] sm:$0xff] %v377_v19 }
 0x16f   :  { %656 = vst [vmem:[#allocation9 + $0xf0] sm:$0xff] %v376_v20  ;;  %1186 = vmatprep.mubr.f32.mxu1 %v376_v20 }
 0x170   :  { %1187 = vmatmul.mubr.f32.gmra.mrb[30].mxu1 %v377_v19 }
 0x207   :  { %v1143_v23 = vpop.f32.mrb[0].mxu1 }
 0x208   :  { %v473_v24 = vadd.f32 %v1143_v23, %v1674_v22  ;;  %v467_v25 = vpop.f32.mrb[1].mxu1 }
 0x209   :  { %v468_v17 = vadd.f32 %v1674_v22, %v467_v25 }
 0x20a   :  { %659 = vst [vmem:[#allocation8 + $0x8] sm:$0xff] %v473_v24  ;;  %v691_v26 = vsub.f32 %v1540_v42, %v473_v24 }
 0x20b   :  { %658 = vst [vmem:[#allocation8] sm:$0xff] %v468_v17  ;;  %v690_v27 = vsub.f32 %v1537_v9, %v468_v17  ;;  %v1146_v28 = vpop.f32.mrb[2].mxu1 }
 0x20c   :  { %v1680_v29 = vmul.f32 %v691_v26, %v691_v26  ;;  %v483_v30 = vadd.f32 %v1146_v28, %v1674_v22  ;;  %v477_v31 = vpop.f32.mrb[3].mxu1 }
 0x20d   :  { %v1683_v32 = vmul.f32 %v690_v27, %v690_v27  ;;  %v478_v33 = vadd.f32 %v1674_v22, %v477_v31 }
 0x20e   :  { %661 = vst [vmem:[#allocation8 + $0x18] sm:$0xff] %v483_v30  ;;  %v693_v34 = vsub.f32 %v1546_v47, %v483_v30 }
 0x20f   :  { %v1255_v35 = vpack.c.bf16 %v1680_v29, %v1683_v32  ;;  %660 = vst [vmem:[#allocation8 + $0x10] sm:$0xff] %v478_v33  ;;  %v692_v42 = vsub.f32 %v1542_v43, %v478_v33  ;;  %v1149_v9 = vpop.f32.mrb[4].mxu1 }
 0x210   :  { %v1690_v36 = vmul.f32 %v693_v34, %v693_v34  ;;  %v493_v37 = vadd.f32 %v1149_v9, %v1674_v22  ;;  %v487_v38 = vpop.f32.mrb[5].mxu1 }
 0x211   :  { %v1693_v39 = vmul.f32 %v692_v42, %v692_v42  ;;  %v488_v40 = vadd.f32 %v1674_v22, %v487_v38 }
 0x212   :  { %663 = vst [vmem:[#allocation8 + $0x28] sm:$0xff] %v493_v37  ;;  %v695_v41 = vsub.f32 %v1552_v50, %v493_v37 }
 0x213   :  { %v1259_v47 = vpack.c.bf16 %v1690_v36, %v1693_v39  ;;  %662 = vst [vmem:[#allocation8 + $0x20] sm:$0xff] %v488_v40  ;;  %v694_v44 = vsub.f32 %v1548_v48, %v488_v40  ;;  %v1152_v43 = vpop.f32.mrb[6].mxu1 }
 0x214   :  { %v1700_v45 = vmul.f32 %v695_v41, %v695_v41  ;;  %v503_v46 = vadd.f32 %v1152_v43, %v1674_v22  ;;  %v497_v49 = vpop.f32.mrb[7].mxu1 }
 0x215   :  { %v1703_v14 = vmul.f32 %v694_v44, %v694_v44  ;;  %v498_v15 = vadd.f32 %v1674_v22, %v497_v49 }
 0x216   :  { %665 = vst [vmem:[#allocation8 + $0x38] sm:$0xff] %v503_v46  ;;  %v697_v16 = vsub.f32 %v1558_v52, %v503_v46 }
 0x217   :  { %v1263_v50 = vpack.c.bf16 %v1700_v45, %v1703_v14  ;;  %664 = vst [vmem:[#allocation8 + $0x30] sm:$0xff] %v498_v15  ;;  %v696_v18 = vsub.f32 %v1554_v51, %v498_v15  ;;  %v1155_v48 = vpop.f32.mrb[8].mxu1 }
 0x218   :  { %v1710_v19 = vmul.f32 %v697_v16, %v697_v16  ;;  %v513_v20 = vadd.f32 %v1155_v48, %v1674_v22  ;;  %v507_v23 = vpop.f32.mrb[9].mxu1 }
 0x219   :  { %v1713_v24 = vmul.f32 %v696_v18, %v696_v18  ;;  %v508_v25 = vadd.f32 %v1674_v22, %v507_v23 }
 0x21a   :  { %667 = vst [vmem:[#allocation8 + $0x48] sm:$0xff] %v513_v20  ;;  %v699_v17 = vsub.f32 %v1564_v54, %v513_v20 }
 0x21b   :  { %v1267_v52 = vpack.c.bf16 %v1710_v19, %v1713_v24  ;;  %666 = vst [vmem:[#allocation8 + $0x40] sm:$0xff] %v508_v25  ;;  %v698_v26 = vsub.f32 %v1560_v53, %v508_v25  ;;  %v1158_v51 = vpop.f32.mrb[10].mxu1 }
 0x21c   :  { %v1720_v27 = vmul.f32 %v699_v17, %v699_v17  ;;  %v523_v28 = vadd.f32 %v1158_v51, %v1674_v22  ;;  %v517_v30 = vpop.f32.mrb[11].mxu1 }
 0x21d   :  { %v1723_v31 = vmul.f32 %v698_v26, %v698_v26  ;;  %v518_v33 = vadd.f32 %v1674_v22, %v517_v30 }
 0x21e   :  { %669 = vst [vmem:[#allocation8 + $0x58] sm:$0xff] %v523_v28  ;;  %v701_v34 = vsub.f32 %v1570_v56, %v523_v28 }
 0x21f   :  { %v1271_v54 = vpack.c.bf16 %v1720_v27, %v1723_v31  ;;  %668 = vst [vmem:[#allocation8 + $0x50] sm:$0xff] %v518_v33  ;;  %v700_v42 = vsub.f32 %v1566_v55, %v518_v33  ;;  %v1161_v53 = vpop.f32.mrb[12].mxu1 }
 0x220   :  { %v1730_v9 = vmul.f32 %v701_v34, %v701_v34  ;;  %v533_v37 = vadd.f32 %v1161_v53, %v1674_v22  ;;  %v527_v38 = vpop.f32.mrb[13].mxu1 }
 0x221   :  { %v1733_v40 = vmul.f32 %v700_v42, %v700_v42  ;;  %v528_v41 = vadd.f32 %v1674_v22, %v527_v38 }
 0x222   :  { %671 = vst [vmem:[#allocation8 + $0x68] sm:$0xff] %v533_v37  ;;  %v703_v44 = vsub.f32 %v1576_v58, %v533_v37 }
 0x223   :  { %v1275_v56 = vpack.c.bf16 %v1730_v9, %v1733_v40  ;;  %670 = vst [vmem:[#allocation8 + $0x60] sm:$0xff] %v528_v41  ;;  %v702_v43 = vsub.f32 %v1572_v57, %v528_v41  ;;  %v1164_v55 = vpop.f32.mrb[14].mxu1 }
 0x224   :  { %v1740_v46 = vmul.f32 %v703_v44, %v703_v44  ;;  %v543_v49 = vadd.f32 %v1164_v55, %v1674_v22  ;;  %v537_v15 = vpop.f32.mrb[15].mxu1 }
 0x225   :  { %v1743_v16 = vmul.f32 %v702_v43, %v702_v43  ;;  %v538_v18 = vadd.f32 %v1674_v22, %v537_v15 }
 0x226   :  { %673 = vst [vmem:[#allocation8 + $0x78] sm:$0xff] %v543_v49  ;;  %v705_v48 = vsub.f32 %v1582_v60, %v543_v49 }
 0x227   :  { %v1279_v58 = vpack.c.bf16 %v1740_v46, %v1743_v16  ;;  %672 = vst [vmem:[#allocation8 + $0x70] sm:$0xff] %v538_v18  ;;  %v704_v20 = vsub.f32 %v1578_v59, %v538_v18  ;;  %v1167_v57 = vpop.f32.mrb[16].mxu1 }
 0x228   :  { %v1750_v23 = vmul.f32 %v705_v48, %v705_v48  ;;  %v553_v25 = vadd.f32 %v1167_v57, %v1674_v22  ;;  %v547_v17 = vpop.f32.mrb[17].mxu1 }
 0x229   :  { %v1753_v26 = vmul.f32 %v704_v20, %v704_v20  ;;  %v548_v51 = vadd.f32 %v1674_v22, %v547_v17 }
 0x22a   :  { %675 = vst [vmem:[#allocation8 + $0x88] sm:$0xff] %v553_v25  ;;  %v707_v28 = vsub.f32 %v1588_v62, %v553_v25 }
 0x22b   :  { %v1283_v60 = vpack.c.bf16 %v1750_v23, %v1753_v26  ;;  %674 = vst [vmem:[#allocation8 + $0x80] sm:$0xff] %v548_v51  ;;  %v706_v30 = vsub.f32 %v1584_v61, %v548_v51  ;;  %v1170_v59 = vpop.f32.mrb[18].mxu1 }
 0x22c   :  { %v739_v33 = vmul.f32 %v707_v28, %v707_v28  ;;  %v563_v34 = vadd.f32 %v1170_v59, %v1674_v22  ;;  %v557_v42 = vpop.f32.mrb[19].mxu1 }
 0x22d   :  { %v738_v53 = vmul.f32 %v706_v30, %v706_v30  ;;  %v558_v37 = vadd.f32 %v1674_v22, %v557_v42 }
 0x22e   :  { %677 = vst [vmem:[#allocation8 + $0x98] sm:$0xff] %v563_v34  ;;  %v709_v38 = vsub.f32 %v1594_v0, %v563_v34 }
 0x22f   :  { %676 = vst [vmem:[#allocation8 + $0x90] sm:$0xff] %v558_v37  ;;  %v708_v62 = vsub.f32 %v1590_v63, %v558_v37  ;;  %v1253_v41 = vpack.c.bf16 %v739_v33, %v738_v53  ;;  %v1173_v44 = vpop.f32.mrb[20].mxu1 }
 0x230   :  { %v741_v43 = vmul.f32 %v709_v38, %v709_v38  ;;  %v573_v55 = vadd.f32 %v1173_v44, %v1674_v22  ;;  %v567_v61 = vpop.f32.mrb[21].mxu1 }
 0x231   :  { %v740_v49 = vmul.f32 %v708_v62, %v708_v62  ;;  %1254 = vmatprep.subr.bf16.mxu0 %v1253_v41  ;;  %v568_v15 = vadd.f32 %v1674_v22, %v567_v61 }
 0x232   :  { %1256 = vmatpush3.bf16.xpose.msra.mxu0 %v1255_v35  ;;  %679 = vst [vmem:[#allocation8 + $0xa8] sm:$0xff] %v573_v55  ;;  %v711_v0 = vsub.f32 %v1600_v2, %v573_v55 }
 0x233   :  { %678 = vst [vmem:[#allocation8 + $0xa0] sm:$0xff] %v568_v15  ;;  %v710_v63 = vsub.f32 %v1596_v1, %v568_v15  ;;  %v1257_v18 = vpack.c.bf16 %v741_v43, %v740_v49  ;;  %v1176_v48 = vpop.f32.mrb[22].mxu1 }
 0x234   :  { %v743_v20 = vmul.f32 %v711_v0, %v711_v0  ;;  %v583_v57 = vadd.f32 %v1176_v48, %v1674_v22  ;;  %v577_v25 = vpop.f32.mrb[23].mxu1 }
 0x235   :  { %v742_v17 = vmul.f32 %v710_v63, %v710_v63  ;;  %1258 = vmatprep.subr.bf16.mxu0 %v1257_v18  ;;  %v578_v51 = vadd.f32 %v1674_v22, %v577_v25 }
 0x236   :  { %681 = vst [vmem:[#allocation8 + $0xb8] sm:$0xff] %v583_v57  ;;  %v713_v29 = vsub.f32 %v1606_v4, %v583_v57 }
 0x237   :  { %680 = vst [vmem:[#allocation8 + $0xb0] sm:$0xff] %v578_v51  ;;  %v712_v32 = vsub.f32 %v1602_v3, %v578_v51  ;;  %v1261_v2 = vpack.c.bf16 %v743_v20, %v742_v17  ;;  %v1179_v35 = vpop.f32.mrb[24].mxu1 }
 0x238   :  { %v745_v28 = vmul.f32 %v713_v29, %v713_v29  ;;  %v593_v1 = vadd.f32 %v1179_v35, %v1674_v22  ;;  %v587_v30 = vpop.f32.mrb[25].mxu1 }
 0x239   :  { %v744_v59 = vmul.f32 %v712_v32, %v712_v32  ;;  %v588_v33 = vadd.f32 %v1674_v22, %v587_v30 }
 0x23a   :  { %1260 = vmatpush3.bf16.xpose.msra.mxu0 %v1259_v47  ;;  %683 = vst [vmem:[#allocation8 + $0xc8] sm:$0xff] %v593_v1  ;;  %v715_v34 = vsub.f32 %v1612_v6, %v593_v1 }
 0x23b   :  { %1262 = vmatprep.subr.bf16.mxu0 %v1261_v2  ;;  %682 = vst [vmem:[#allocation8 + $0xc0] sm:$0xff] %v588_v33  ;;  %v714_v3 = vsub.f32 %v1608_v5, %v588_v33  ;;  %v1265_v4 = vpack.c.bf16 %v745_v28, %v744_v59  ;;  %v1182_v42 = vpop.f32.mrb[26].mxu1 }
 0x23c   :  { %v747_v53 = vmul.f32 %v715_v34, %v715_v34  ;;  %v603_v37 = vadd.f32 %v1182_v42, %v1674_v22  ;;  %v597_v38 = vpop.f32.mrb[27].mxu1 }
 0x23d   :  { %v746_v62 = vmul.f32 %v714_v3, %v714_v3  ;;  %v598_v41 = vadd.f32 %v1674_v22, %v597_v38 }
 0x23e   :  { %685 = vst [vmem:[#allocation8 + $0xd8] sm:$0xff] %v603_v37  ;;  %v717_v36 = vsub.f32 %v1618_v8, %v603_v37 }
 0x23f   :  { %684 = vst [vmem:[#allocation8 + $0xd0] sm:$0xff] %v598_v41  ;;  %v716_v39 = vsub.f32 %v1614_v7, %v598_v41  ;;  %v1269_v6 = vpack.c.bf16 %v747_v53, %v746_v62  ;;  %v1185_v47 = vpop.f32.mrb[28].mxu1 }
 0x240   :  { %v749_v44 = vmul.f32 %v717_v36, %v717_v36  ;;  %v613_v5 = vadd.f32 %v1185_v47, %v1674_v22  ;;  %v607_v43 = vpop.f32.mrb[29].mxu1 }
 0x241   :  { %v748_v55 = vmul.f32 %v716_v39, %v716_v39  ;;  %v608_v61 = vadd.f32 %v1674_v22, %v607_v43 }
 0x242   :  { %1264 = vmatpush3.bf16.xpose.msra.mxu0 %v1263_v50  ;;  %687 = vst [vmem:[#allocation8 + $0xe8] sm:$0xff] %v613_v5  ;;  %v719_v49 = vsub.f32 %v1624_v11, %v613_v5 }
 0x243   :  { %1266 = vmatprep.subr.bf16.mxu0 %v1265_v4  ;;  %686 = vst [vmem:[#allocation8 + $0xe0] sm:$0xff] %v608_v61  ;;  %v718_v7 = vsub.f32 %v1620_v10, %v608_v61  ;;  %v1273_v8 = vpack.c.bf16 %v749_v44, %v748_v55  ;;  %v1188_v15 = vpop.f32.mrb[30].mxu1 }
 0x244   :  { %v751_v0 = vmul.f32 %v719_v49, %v719_v49  ;;  %v623_v63 = vadd.f32 %v1188_v15, %v1674_v22  ;;  %v617_v18 = vpop.f32.mrb[31].mxu1 }
 0x245   :  { %v750_v48 = vmul.f32 %v718_v7, %v718_v7  ;;  %v618_v20 = vadd.f32 %v1674_v22, %v617_v18 }
 0x246   :  { %689 = vst [vmem:[#allocation8 + $0xf8] sm:$0xff] %v623_v63  ;;  %v721_v45 = vsub.f32 %v1630_v13, %v623_v63 }
 0x247   :  { %688 = vst [vmem:[#allocation8 + $0xf0] sm:$0xff] %v618_v20  ;;  %v720_v14 = vsub.f32 %v1626_v12, %v618_v20  ;;  %v1277_v11 = vpack.c.bf16 %v751_v0, %v750_v48 }
 0x248   :  { %v753_v50 = vmul.f32 %v721_v45, %v721_v45 }
 0x249   :  { %v752_v57 = vmul.f32 %v720_v14, %v720_v14 }
 0x24a   :  { %1268 = vmatpush3.bf16.xpose.msra.mxu0 %v1267_v52 }
 0x24b   :  { %1270 = vmatprep.subr.bf16.mxu0 %v1269_v6  ;;  %v1281_v10 = vpack.c.bf16 %v753_v50, %v752_v57 }
 0x252   :  { %1272 = vmatpush3.bf16.xpose.msra.mxu0 %v1271_v54 }
 0x253   :  { %1274 = vmatprep.subr.bf16.mxu0 %v1273_v8 }
 0x25a   :  { %1276 = vmatpush3.bf16.xpose.msra.mxu0 %v1275_v56 }
 0x25b   :  { %1278 = vmatprep.subr.bf16.mxu0 %v1277_v11 }
 0x262   :  { %1280 = vmatpush3.bf16.xpose.msra.mxu0 %v1279_v58 }
 0x263   :  { %1282 = vmatprep.subr.bf16.mxu0 %v1281_v10 }
 0x26a   :  { %1284 = vmatpush3.bf16.xpose.msra.mxu0 %v1283_v60 }
 0x271   :  { %1028 = vmatmul.mubr.f32.vlgmr.msra.gmra.mrb[32].mxu0 %v1440_v21 }
 0x272   :  { %1372 = shalt.err (!%p1369_p0)
}
 0x273   :  { %s1373_s24 = scalar_lea.hbm %s1861_s6, 4096 }
 0x274   :  { %p1374_p1 = scmp.ne.s32.totalorder %s1861_s6, %s1373_s24  ;;  %p1377_p2 = scmp.lt.u32.totalorder %s1373_s24, %s1861_s6 }
 0x276   :  { %p1379_p3 = pnand %p1377_p2, %p1374_p1 }
 0x278   :  { %1382 = shalt.err (!%p1379_p3)
}
 0x279   :  { %873 = dma.vmem_to_hbm [thread:$0]  %s868_s18, 4096, %s1861_s6, [#allocation10], %s1437_s13, %s1437_s13, %s1438_s14  }
 0x27a   :  { %s1383_s8 = scalar_lea.vmem %s856_s20, 4096  ;;  %p1388_p5 = scmp.lt.s32.totalorder %s856_s20, %s856_s20 }
 0x27b   :  { %p1384_p4 = scmp.ne.s32.totalorder %s856_s20, %s1383_s8  ;;  %p1389_p6 = scmp.lt.s32.totalorder %s1383_s8, %s1383_s8 }
 0x27d   :  { %p1390_p7 = por %p1389_p6, %p1388_p5 }
 0x27f   :  { %p1391_p8 = pnand %p1390_p7, %p1384_p4 }
 0x281   :  { %1394 = shalt.err (!%p1391_p8)
}
 0x282   :  { %s1395_s11 = scalar_lea.hbm %s1860_s5, 4096 }
 0x283   :  { %p1396_p9 = scmp.ne.s32.totalorder %s1860_s5, %s1395_s11  ;;  %p1399_p10 = scmp.lt.u32.totalorder %s1395_s11, %s1860_s5 }
 0x285   :  { %p1401_p11 = pnand %p1399_p10, %p1396_p9 }
 0x287   :  { %1404 = shalt.err (!%p1401_p11)
}
 0x288   :  { %861 = dma.vmem_to_hbm [thread:$0]  %s856_s20, 4096, %s1860_s5, [#allocation4], %s1437_s13, %s1437_s13, %s1438_s14   ;;  %v1443_v12 = vmov 1966171168   ;;  %v833_v21 = vlaneseq }
 0x289   :  { %v831_v13 = vunpack.c.l.s4 %v1443_v12  ;;  %s1444_s16 = smov [#allocation11]  }
 0x28a   :  { %v834_v19 = vshrl.u32 %v833_v21, 7  ;;  %s880_s2 = sshll.u32 %s1444_s16, 4  ;;  %vm847_vm0 = vcmp.lt.s32.totalorder %v833_v21, 256  ;;  %s881_s2 = int_to_ptr.vmem [resolvable:$true] %s880_s2 }
 0x28b   :  { %v832_v22 = vunpack.c.0.s8 %v831_v13  ;;  %s1405_s17 = scalar_lea.vmem %s881_s2, 32  ;;  %p1410_p13 = scmp.lt.s32.totalorder %s881_s2, %s881_s2 }
 0x28c   :  { %p1406_p12 = scmp.ne.s32.totalorder %s881_s2, %s1405_s17  ;;  %p1411_p0 = scmp.lt.s32.totalorder %s1405_s17, %s1405_s17 }
 0x28d   :  { %v835_v54 = vsub.s32 %v832_v22, %v834_v19 }
 0x28e   :  { %p1412_p1 = por %p1411_p0, %p1410_p13 }
 0x290   :  { %p1413_p2 = pnand %p1412_p1, %p1406_p12 }
 0x344   :  { %v820_v24 = vpop.f32.mrb[32].mxu0 }
 0x345   :  { %v825_v52 = vmul.f32 0.03125, %v820_v24  ;;  %v822_v27 = vpop.f32.mrb[33].mxu0 }
 0x346   :  { %v826_v31 = vmul.f32 0.03125, %v822_v27 }
 0x348   :  { %v829_v9 = vcombine.low %v825_v52, %v826_v31 }
 0x34a   :  { %v836_v40 = vrot.slane %v829_v9, %v835_v54 }
 0x34c   :  { %v843_v56 = vrot.slane %v836_v40, %v835_v54 }
 0x34e   :  { %849 = vst.msk [vmem:[#allocation11] sm:$0x3] %vm847_vm0, %v843_v56 }
 0x34f   :  { %1416 = shalt.err (!%p1413_p2)
}
 0x350   :  { %s1417_s14 = scalar_lea.hbm %s1862_s7, 32 }
 0x351   :  { %p1418_p3 = scmp.ne.s32.totalorder %s1862_s7, %s1417_s14  ;;  %p1421_p4 = scmp.lt.u32.totalorder %s1417_s14, %s1862_s7 }
 0x353   :  { %p1423_p5 = pnand %p1421_p4, %p1418_p3 }
 0x355   :  { %1426 = shalt.err (!%p1423_p5)
}
 0x356   :  { %883 = dma.vmem_to_hbm [thread:$0]  %s881_s2, 32, %s1862_s7, [#allocation10]  }
 0x357   :  { %1431 = dma.done.wait [#allocation4], 4096  }
 0x358   :  { %1432 = vsyncadd [#allocation4], 4294963200 }
 0x359   :  { %1433 = dma.done.wait [#allocation10], 4128  }
 0x35a   :  { %1434 = vsyncadd [#allocation10], 4294963168 }
 0x35b   :  { %893 = vsyncpa [#allocation3], 1 }
 0x35c   :  { %894 = vsyncpa [#allocation6], 1 }
 0x35d   :  { %895 = vsyncpa [#allocation4], 1 }
 0x35e   :  { %896 = vsyncpa [#allocation10], 1 }

</bundles_post_ra>
